<compile_context>
chip_gen: v7x
topology: tpu7x:2x2x1
jax: 0.10.0
libtpu: 0.0.40
codegen_flags: <defaults>
</compile_context>

<pallas_src>
import functools

import jax
import jax.numpy as jnp
from jax.experimental import pallas as pl
from jax.experimental.pallas import tpu as pltpu


_PAD_BIAS = -1e30          # bias of padded class lanes -> softmax weight 0


def _round_up(n, m):
    return ((n + m - 1) // m) * m


def _pick_tile(n, candidates):
    for c in candidates:
        if c <= n and n % c == 0:
            return c
    return n


def pack_svgd_params(W, A, B_up, bias, *, weight_dtype=jnp.bfloat16):
    """Fold LoRA + pad + pack + cast the per-particle heads.

    Call ONCE at init / after each parameter update -- NOT per forward.
    (Hoisting this out of the hot path is the whole point: it reads/writes the
    full weight tensors and would otherwise double the forward's HBM traffic.)

    W: [P, D, K], A: [P, D, r], B_up: [P, r, K], bias: [P, K]
    Returns:
      wa_packed   [D, P*KB]  (weight_dtype), KB = ceil(K/128)*128; column block
                  p holds W_p + A_p @ B_up_p in lanes [p*KB, p*KB+K), zeros after
      bias_packed [1, P*KB]  f32; real bias in the first K lanes of each block,
                  -1e30 in the pad lanes.
    """
    P, D, K = W.shape
    KB = _round_up(K, 128)
    # Exact LoRA fold into an effective dense head (f32).
    w_eff = W.astype(jnp.float32) + jnp.einsum(
        'pdr,prk->pdk', A.astype(jnp.float32), B_up.astype(jnp.float32))
    w_eff = jnp.pad(w_eff, ((0, 0), (0, 0), (0, KB - K)))           # [P, D, KB]
    wa_packed = (jnp.transpose(w_eff, (1, 0, 2))
                 .reshape(D, P * KB)
                 .astype(weight_dtype))
    bias_pad = jnp.pad(bias.astype(jnp.float32), ((0, 0), (0, KB - K)),
                       constant_values=_PAD_BIAS)
    bias_packed = bias_pad.reshape(1, P * KB)
    return wa_packed, bias_packed


def _svgd_head_kernel(x_ref, w_ref, bias_ref, logits_ref, ent_ref, acc_ref, *,
                      num_particles, num_classes, class_block):
    P, K, KB = num_particles, num_classes, class_block
    k = pl.program_id(1)                       # D-reduction step (last grid axis)
    nk = pl.num_programs(1)

    @pl.when(k == 0)
    def _init():
        acc_ref[...] = jnp.zeros_like(acc_ref)

    x = x_ref[...]                             # [tb, tk]   f32 from HBM
    w = w_ref[...]                             # [tk, P*KB] bf16 (or f32)
    if x.dtype != w.dtype:
        x = x.astype(w.dtype)                  # in-kernel cast, hidden by the MXU
    acc_ref[...] += jnp.dot(x, w, preferred_element_type=jnp.float32)

    @pl.when(k == nk - 1)
    def _finalize():
        y = acc_ref[...] + bias_ref[...]       # [tb, P*KB] f32; pad lanes ~ -1e30
        inv_p = jnp.float32(1.0 / P)
        tb = y.shape[0]
        logits_sum = jnp.zeros((tb, KB), jnp.float32)
        ent_sum = jnp.zeros((tb, 1), jnp.float32)
        # Short static unroll over particles; every slice is a whole number of
        # 128-lane vregs (no lane shuffles).  For P >~ 8 switch to
        # lax.fori_loop(..., unroll=True) over pl.ds(p * KB, KB) slices so vreg
        # live ranges stay bounded.
        for p in range(P):
            l = y[:, p * KB:(p + 1) * KB]                        # [tb, KB]
            m = jnp.max(l, axis=1, keepdims=True)
            e = jnp.exp(l - m)                                   # pad lanes -> 0
            s = jnp.sum(e, axis=1, keepdims=True)
            sft = e / s
            # pad lanes: sft == 0 -> 0 * log(1e-8) == 0, no explicit mask needed
            ent_sum += -jnp.sum(sft * jnp.log(sft + 1e-8), axis=1, keepdims=True)
            logits_sum += l
        lane = jax.lax.broadcasted_iota(jnp.int32, (tb, KB), 1)
        logits_ref[...] = jnp.where(lane < K, logits_sum * inv_p, 0.0)
        ent_ref[...] = jnp.broadcast_to(ent_sum * inv_p, ent_ref.shape)


def svgd_forward(image, wa_packed, bias_packed, *, num_particles, num_classes):
    """Ensemble-head forward on pre-packed params.

    image:       [B, C, H, W] f32 (flattened to [B, D] internally)
    wa_packed:   [D, P*KB]    from pack_svgd_params (bf16 recommended)
    bias_packed: [1, P*KB]    f32
    returns (mean logits [B, K], mean entropy [B])
    """
    P, K = num_particles, num_classes
    B = image.shape[0]
    D, n_tot = wa_packed.shape
    KB = n_tot // P
    assert KB * P == n_tot and KB >= K
    x = image.reshape(B, D)        # row-major flatten == torch image.reshape(B,-1)
    # x stays in its input dtype; the cast to the weight dtype (if any) happens
    # inside the kernel -> no extra wrapper-side HBM pass over the activations.

    # Tiling: batch tiles ("parallel" -> feeds both TCs on v7x once B is big),
    # D-reduction tiles ("arbitrary", innermost) with a resident f32 accumulator.
    tb = _pick_tile(B, (256, 128, 64, 32, 16, 8)) if B % 8 == 0 else B
    tk = _pick_tile(D, (512, 256, 128))
    grid = (B // tb, D // tk)
    # VMEM per step ~ 2*(tb*tk*4 + tk*n_tot*itemsize) + tb*n_tot*4 (+ outputs);
    # keep it under the scoped limit (16 MiB v5e / 32 MiB v6e,v7x default) for
    # wide heads by shrinking tk, or raise vmem_limit_bytes (v7x physical VMEM
    # is only 64 MiB).

    kernel = functools.partial(_svgd_head_kernel, num_particles=P,
                               num_classes=K, class_block=KB)

    logits_pad, ent_pad = pl.pallas_call(
        kernel,
        out_shape=(
            jax.ShapeDtypeStruct((B, KB), jnp.float32),    # lane-dense logits slab
            jax.ShapeDtypeStruct((B, 128), jnp.float32),   # entropy broadcast slab
        ),
        grid_spec=pltpu.PrefetchScalarGridSpec(
            num_scalar_prefetch=0,
            grid=grid,
            in_specs=[
                pl.BlockSpec((tb, tk), lambda bi, ki: (bi, ki)),     # x
                pl.BlockSpec((tk, n_tot), lambda bi, ki: (ki, 0)),   # packed weights
                pl.BlockSpec((1, n_tot), lambda bi, ki: (0, 0)),     # packed bias
            ],
            out_specs=(
                pl.BlockSpec((tb, KB), lambda bi, ki: (bi, 0)),
                pl.BlockSpec((tb, 128), lambda bi, ki: (bi, 0)),
            ),
            scratch_shapes=[pltpu.VMEM((tb, n_tot), jnp.float32)],
        ),
        compiler_params=pltpu.CompilerParams(
            dimension_semantics=("parallel", "arbitrary")),
    )(x, wa_packed, bias_packed)

    # Tiny wrapper-side slices of the lane-dense output slabs.
    return logits_pad[:, :K], ent_pad[:, 0]


def _reference(image, W, A, B_up, bias):
    Bb = image.shape[0]
    x = image.reshape(Bb, -1)
    logits_all, ent_all = [], []
    for p in range(W.shape[0]):
        l = x @ (W[p] + A[p] @ B_up[p]) + bias[p]
        sft = jax.nn.softmax(l, axis=1)
        ent_all.append(-(sft * jnp.log(sft + 1e-8)).sum(1))
        logits_all.append(l)
    return jnp.stack(logits_all).mean(0), jnp.stack(ent_all).mean(0)


if __name__ == "__main__":
    # Small shapes consistent with the module's forward.
    B, C, H, Wd = 2, 4, 16, 16        # image: NCHW
    D = C * H * Wd                    # flattened feature dim = 1024
    K = 8                             # number of classes
    P = 3                             # num_particles (== int(config('opt')))
    r = 4                             # lora_r=4

    key = jax.random.PRNGKey(0)
    k_img, k_w, k_a, k_b, k_bias = jax.random.split(key, 5)

    image = jax.random.normal(k_img, (B, C, H, Wd), dtype=jnp.float32)
    W = jax.random.normal(k_w, (P, D, K), dtype=jnp.float32) * 0.02
    A = jax.random.normal(k_a, (P, D, r), dtype=jnp.float32) * 0.02
    B_up = jax.random.normal(k_b, (P, r, K), dtype=jnp.float32) * 0.02
    bias = jax.random.normal(k_bias, (P, K), dtype=jnp.float32) * 0.01

    ref_logits, ref_ent = _reference(image, W, A, B_up, bias)

    fwd = jax.jit(functools.partial(svgd_forward, num_particles=P, num_classes=K))

    # Exact path: f32 packed weights (packing is done ONCE, outside the forward).
    wa32, b32 = pack_svgd_params(W, A, B_up, bias, weight_dtype=jnp.float32)
    logits, entropies = fwd(image, wa32, b32)
    jax.block_until_ready((logits, entropies))
    assert logits.shape == (B, K) and entropies.shape == (B,)
    assert jnp.allclose(logits, ref_logits, atol=1e-4, rtol=1e-4)
    assert jnp.allclose(entropies, ref_ent, atol=1e-4, rtol=1e-4)

    # bf16 packed weights: halves the weight DMA bytes on v5e/v6e/v7x alike
    # (cast once at pack time; activations cast in-kernel, softmax stays f32).
    wa16, b16 = pack_svgd_params(W, A, B_up, bias, weight_dtype=jnp.bfloat16)
    logits_bf, entropies_bf = fwd(image, wa16, b16)
    jax.block_until_ready((logits_bf, entropies_bf))
    assert jnp.allclose(logits_bf, ref_logits, atol=5e-2, rtol=5e-2)
    assert jnp.allclose(entropies_bf, ref_ent, atol=5e-2, rtol=5e-2)

    # TODO(synk): the CLIP ViT backbone, get_losses (criterion), and the SVGD
    # update_grads particle-gradient coupling are training/host-side logic and
    # are not lowered to Pallas here; only the ensemble-head forward hot path is.
    print("KERNEL_OK")
</pallas_src>

<mosaic_0001>
module attributes {stable_mosaic.version = 11 : i64} {
  func.func @_svgd_head_kernel(%arg0: i32, %arg1: i32, %arg2: memref<2x512xf32, #tpu.memory_space<vmem>>, %arg3: memref<512x384xf32, #tpu.memory_space<vmem>>, %arg4: memref<1x384xf32, #tpu.memory_space<vmem>>, %arg5: memref<2x128xf32, #tpu.memory_space<vmem>>, %arg6: memref<2x128xf32, #tpu.memory_space<vmem>>, %arg7: memref<2x384xf32, #tpu.memory_space<vmem>>) attributes {dimension_semantics = [#tpu.dimension_semantics<parallel>, #tpu.dimension_semantics<arbitrary>], iteration_bounds = array<i64: 1, 2>, scalar_prefetch = 0 : i64, scratch_operands = 1 : i64, tpu.core_type = #tpu.core_type<tc>, window_params = [{transform_indices = @transform_0, window_bounds = array<i64: 2, 512>}, {transform_indices = @transform_1, window_bounds = array<i64: 512, 384>}, {pipeline_mode = #tpu.pipeline_mode<synchronous>, transform_indices = @transform_2, window_bounds = array<i64: 1, 384>}, {transform_indices = @transform_3, window_bounds = array<i64: 2, 128>}, {transform_indices = @transform_4, window_bounds = array<i64: 2, 128>}]} {
    %c0_i32 = arith.constant 0 : i32
    %0 = arith.cmpi eq, %arg1, %c0_i32 : i32
    %1 = arith.extui %0 : i1 to i32
    %c0_i32_0 = arith.constant 0 : i32
    %2 = arith.cmpi ne, %1, %c0_i32_0 : i32
    scf.if %2 {
      %cst_9 = arith.constant 0.000000e+00 : f32
      %12 = vector.broadcast %cst_9 : f32 to vector<2x384xf32>
      %c0_10 = arith.constant 0 : index
      %c0_11 = arith.constant 0 : index
      %13 = vector.load %arg7[%c0_10, %c0_11] : memref<2x384xf32, #tpu.memory_space<vmem>>, vector<2x384xf32>
      tpu.vector_store %arg7[%c0_10, %c0_11], %12 {strides = array<i32>} : memref<2x384xf32, #tpu.memory_space<vmem>>, vector<2x384xf32>,
    } else {
    }
    %c0 = arith.constant 0 : index
    %c0_1 = arith.constant 0 : index
    %3 = vector.load %arg2[%c0, %c0_1] : memref<2x512xf32, #tpu.memory_space<vmem>>, vector<2x512xf32>
    %c0_2 = arith.constant 0 : index
    %c0_3 = arith.constant 0 : index
    %4 = vector.load %arg3[%c0_2, %c0_3] : memref<512x384xf32, #tpu.memory_space<vmem>>, vector<512x384xf32>
    %c0_4 = arith.constant 0 : index
    %c0_5 = arith.constant 0 : index
    %5 = vector.load %arg7[%c0_4, %c0_5] : memref<2x384xf32, #tpu.memory_space<vmem>>, vector<2x384xf32>
    %cst = arith.constant dense<0.000000e+00> : vector<2x384xf32>
    %6 = tpu.matmul %3, %4, %cst {dimension_numbers = #tpu.dot_dimension_numbers<[1], [0], [0], [1], [0, 0, 1, 1], [], []>} : vector<2x512xf32>, vector<512x384xf32>, vector<2x384xf32> -> vector<2x384xf32>
    %7 = arith.addf %5, %6 : vector<2x384xf32>
    %c0_6 = arith.constant 0 : index
    %c0_7 = arith.constant 0 : index
    %8 = vector.load %arg7[%c0_6, %c0_7] : memref<2x384xf32, #tpu.memory_space<vmem>>, vector<2x384xf32>
    tpu.vector_store %arg7[%c0_6, %c0_7], %7 {strides = array<i32>} : memref<2x384xf32, #tpu.memory_space<vmem>>, vector<2x384xf32>,
    %c1_i32 = arith.constant 1 : i32
    %9 = arith.cmpi eq, %arg1, %c1_i32 : i32
    %10 = arith.extui %9 : i1 to i32
    %c0_i32_8 = arith.constant 0 : i32
    %11 = arith.cmpi ne, %10, %c0_i32_8 : i32
    scf.if %11 {
      %c0_9 = arith.constant 0 : index
      %c0_10 = arith.constant 0 : index
      %12 = vector.load %arg7[%c0_9, %c0_10] : memref<2x384xf32, #tpu.memory_space<vmem>>, vector<2x384xf32>
      %c0_11 = arith.constant 0 : index
      %c0_12 = arith.constant 0 : index
      %13 = vector.load %arg4[%c0_11, %c0_12] : memref<1x384xf32, #tpu.memory_space<vmem>>, vector<1x384xf32>
      %14 = vector.broadcast %13 : vector<1x384xf32> to vector<2x384xf32>
      %15 = arith.addf %12, %14 : vector<2x384xf32>
      %cst_13 = arith.constant 0.000000e+00 : f32
      %16 = vector.broadcast %cst_13 : f32 to vector<2x128xf32>
      %cst_14 = arith.constant 0.000000e+00 : f32
      %17 = vector.broadcast %cst_14 : f32 to vector<2x1xf32>
      %18 = vector.extract_strided_slice %15 {offsets = [0, 0], sizes = [2, 128], strides = [1, 1]} : vector<2x384xf32> to vector<2x128xf32>
      %cst_15 = arith.constant dense<0xFF800000> : vector<2xf32>
      %19 = vector.multi_reduction <maximumf>, %18, %cst_15 [1] : vector<2x128xf32> to vector<2xf32>
      %20 = vector.shape_cast %19 : vector<2xf32> to vector<2x1xf32>
      %21 = vector.broadcast %20 : vector<2x1xf32> to vector<2x128xf32>
      %22 = arith.subf %18, %21 : vector<2x128xf32>
      %23 = math.exp %22 : vector<2x128xf32>
      %cst_16 = arith.constant dense<0.000000e+00> : vector<2xf32>
      %24 = vector.multi_reduction <add>, %23, %cst_16 [1] : vector<2x128xf32> to vector<2xf32>
      %25 = vector.shape_cast %24 : vector<2xf32> to vector<2x1xf32>
      %26 = vector.broadcast %25 : vector<2x1xf32> to vector<2x128xf32>
      %27 = arith.divf %23, %26 : vector<2x128xf32>
      %cst_17 = arith.constant 9.99999993E-9 : f32
      %28 = vector.broadcast %cst_17 : f32 to vector<2x128xf32>
      %29 = arith.addf %27, %28 : vector<2x128xf32>
      %30 = math.log %29 : vector<2x128xf32>
      %31 = arith.mulf %27, %30 : vector<2x128xf32>
      %cst_18 = arith.constant dense<0.000000e+00> : vector<2xf32>
      %32 = vector.multi_reduction <add>, %31, %cst_18 [1] : vector<2x128xf32> to vector<2xf32>
      %33 = vector.shape_cast %32 : vector<2xf32> to vector<2x1xf32>
      %cst_19 = arith.constant 0.000000e+00 : f32
      %34 = vector.broadcast %cst_19 : f32 to vector<2x1xf32>
      %35 = arith.subf %34, %33 : vector<2x1xf32>
      %36 = arith.addf %17, %35 : vector<2x1xf32>
      %37 = arith.addf %16, %18 : vector<2x128xf32>
      %38 = vector.extract_strided_slice %15 {offsets = [0, 128], sizes = [2, 128], strides = [1, 1]} : vector<2x384xf32> to vector<2x128xf32>
      %cst_20 = arith.constant dense<0xFF800000> : vector<2xf32>
      %39 = vector.multi_reduction <maximumf>, %38, %cst_20 [1] : vector<2x128xf32> to vector<2xf32>
      %40 = vector.shape_cast %39 : vector<2xf32> to vector<2x1xf32>
      %41 = vector.broadcast %40 : vector<2x1xf32> to vector<2x128xf32>
      %42 = arith.subf %38, %41 : vector<2x128xf32>
      %43 = math.exp %42 : vector<2x128xf32>
      %cst_21 = arith.constant dense<0.000000e+00> : vector<2xf32>
      %44 = vector.multi_reduction <add>, %43, %cst_21 [1] : vector<2x128xf32> to vector<2xf32>
      %45 = vector.shape_cast %44 : vector<2xf32> to vector<2x1xf32>
      %46 = vector.broadcast %45 : vector<2x1xf32> to vector<2x128xf32>
      %47 = arith.divf %43, %46 : vector<2x128xf32>
      %cst_22 = arith.constant 9.99999993E-9 : f32
      %48 = vector.broadcast %cst_22 : f32 to vector<2x128xf32>
      %49 = arith.addf %47, %48 : vector<2x128xf32>
      %50 = math.log %49 : vector<2x128xf32>
      %51 = arith.mulf %47, %50 : vector<2x128xf32>
      %cst_23 = arith.constant dense<0.000000e+00> : vector<2xf32>
      %52 = vector.multi_reduction <add>, %51, %cst_23 [1] : vector<2x128xf32> to vector<2xf32>
      %53 = vector.shape_cast %52 : vector<2xf32> to vector<2x1xf32>
      %cst_24 = arith.constant 0.000000e+00 : f32
      %54 = vector.broadcast %cst_24 : f32 to vector<2x1xf32>
      %55 = arith.subf %54, %53 : vector<2x1xf32>
      %56 = arith.addf %36, %55 : vector<2x1xf32>
      %57 = arith.addf %37, %38 : vector<2x128xf32>
      %58 = vector.extract_strided_slice %15 {offsets = [0, 256], sizes = [2, 128], strides = [1, 1]} : vector<2x384xf32> to vector<2x128xf32>
      %cst_25 = arith.constant dense<0xFF800000> : vector<2xf32>
      %59 = vector.multi_reduction <maximumf>, %58, %cst_25 [1] : vector<2x128xf32> to vector<2xf32>
      %60 = vector.shape_cast %59 : vector<2xf32> to vector<2x1xf32>
      %61 = vector.broadcast %60 : vector<2x1xf32> to vector<2x128xf32>
      %62 = arith.subf %58, %61 : vector<2x128xf32>
      %63 = math.exp %62 : vector<2x128xf32>
      %cst_26 = arith.constant dense<0.000000e+00> : vector<2xf32>
      %64 = vector.multi_reduction <add>, %63, %cst_26 [1] : vector<2x128xf32> to vector<2xf32>
      %65 = vector.shape_cast %64 : vector<2xf32> to vector<2x1xf32>
      %66 = vector.broadcast %65 : vector<2x1xf32> to vector<2x128xf32>
      %67 = arith.divf %63, %66 : vector<2x128xf32>
      %cst_27 = arith.constant 9.99999993E-9 : f32
      %68 = vector.broadcast %cst_27 : f32 to vector<2x128xf32>
      %69 = arith.addf %67, %68 : vector<2x128xf32>
      %70 = math.log %69 : vector<2x128xf32>
      %71 = arith.mulf %67, %70 : vector<2x128xf32>
      %cst_28 = arith.constant dense<0.000000e+00> : vector<2xf32>
      %72 = vector.multi_reduction <add>, %71, %cst_28 [1] : vector<2x128xf32> to vector<2xf32>
      %73 = vector.shape_cast %72 : vector<2xf32> to vector<2x1xf32>
      %cst_29 = arith.constant 0.000000e+00 : f32
      %74 = vector.broadcast %cst_29 : f32 to vector<2x1xf32>
      %75 = arith.subf %74, %73 : vector<2x1xf32>
      %76 = arith.addf %56, %75 : vector<2x1xf32>
      %77 = arith.addf %57, %58 : vector<2x128xf32>
      %78 = tpu.iota {dimensions = array<i32: 1>} : vector<2x128xi32>
      %c8_i32 = arith.constant 8 : i32
      %79 = vector.broadcast %c8_i32 : i32 to vector<2x128xi32>
      %80 = arith.cmpi slt, %78, %79 : vector<2x128xi32>
      %cst_30 = arith.constant 0.333333343 : f32
      %81 = vector.broadcast %cst_30 : f32 to vector<2x128xf32>
      %82 = arith.mulf %77, %81 : vector<2x128xf32>
      %cst_31 = arith.constant 0.000000e+00 : f32
      %83 = vector.broadcast %cst_31 : f32 to vector<2x128xf32>
      %84 = arith.select %80, %82, %83 : vector<2x128xi1>, vector<2x128xf32>
      %c0_32 = arith.constant 0 : index
      %c0_33 = arith.constant 0 : index
      %85 = vector.load %arg5[%c0_32, %c0_33] : memref<2x128xf32, #tpu.memory_space<vmem>>, vector<2x128xf32>
      tpu.vector_store %arg5[%c0_32, %c0_33], %84 {strides = array<i32>} : memref<2x128xf32, #tpu.memory_space<vmem>>, vector<2x128xf32>,
      %cst_34 = arith.constant 0.333333343 : f32
      %86 = vector.broadcast %cst_34 : f32 to vector<2x1xf32>
      %87 = arith.mulf %76, %86 : vector<2x1xf32>
      %88 = vector.shape_cast %87 : vector<2x1xf32> to vector<2x1xf32>
      %89 = vector.broadcast %88 : vector<2x1xf32> to vector<2x128xf32>
      %c0_35 = arith.constant 0 : index
      %c0_36 = arith.constant 0 : index
      %90 = vector.load %arg6[%c0_35, %c0_36] : memref<2x128xf32, #tpu.memory_space<vmem>>, vector<2x128xf32>
      tpu.vector_store %arg6[%c0_35, %c0_36], %89 {strides = array<i32>} : memref<2x128xf32, #tpu.memory_space<vmem>>, vector<2x128xf32>,
    } else {
    }
    return
  }
  func.func @transform_0(%arg0: i32, %arg1: i32) -> (i32, i32) {
    %c0_i32 = arith.constant 0 : i32
    return %arg0, %arg1 : i32, i32
  }
  func.func @transform_1(%arg0: i32, %arg1: i32) -> (i32, i32) {
    %c0_i32 = arith.constant 0 : i32
    %c0_i32_0 = arith.constant 0 : i32
    return %arg1, %c0_i32 : i32, i32
  }
  func.func @transform_2(%arg0: i32, %arg1: i32) -> (i32, i32) {
    %c0_i32 = arith.constant 0 : i32
    %c0_i32_0 = arith.constant 0 : i32
    %c0_i32_1 = arith.constant 0 : i32
    return %c0_i32, %c0_i32_0 : i32, i32
  }
  func.func @transform_3(%arg0: i32, %arg1: i32) -> (i32, i32) {
    %c0_i32 = arith.constant 0 : i32
    %c0_i32_0 = arith.constant 0 : i32
    return %arg0, %c0_i32 : i32, i32
  }
  func.func @transform_4(%arg0: i32, %arg1: i32) -> (i32, i32) {
    %c0_i32 = arith.constant 0 : i32
    %c0_i32_0 = arith.constant 0 : i32
    return %arg0, %c0_i32 : i32, i32
  }
}

</mosaic_0001>

<bundles_post_ra>
// kernel: svgd_forward.1
= control target key start
LH: loop header
LB: loop body
LE: loop exit
PB: predicated region body
PF: predicated region fallthrough
CT: control target
= control target key end

     0   :  { %10 = vsyncpa [#allocation4], 0  ;;  %s2067_s0 = inlined_call_operand.vmem [shape: f32[2,1024], index: 0, kind: input, shape index: {}]   ;;  %s2068_s1 = inlined_call_operand.hbm [shape: f32[1024,384], index: 1, kind: input, shape index: {}]   ;;  %s2069_s2 = inlined_call_operand.hbm [shape: f32[1,384], index: 2, kind: input, shape index: {}]   ;;  %s2070_s3 = inlined_call_operand.hbm [shape: f32[2,128], index: 3, kind: output, shape index: {0}]   ;;  %s2071_s4 = inlined_call_operand.vmem [shape: f32[2,128], index: 4, kind: output, shape index: {1}]  }
   0x1   :  { %12 = vsyncpa [#allocation4 + $0x1], 0 }
   0x2   :  { %13 = vsyncpa [#allocation7], 0 }
   0x3   :  { %14 = vsyncpa [#allocation5], 0  ;;  %s1623_s15 = smov 0   ;;  %s1625_s16 = smov 0  }
   0x4   :  { %s1627_s17 = smov 0   ;;  %s1629_s18 = smov 0  }
   0x5   :  { %s1631_s19 = smov 0   ;;  %s1633_s20 = smov 0  }
   0x6 LB: > { %s1066_s21 = sadd.s32 4294967295, %s1589_s20   ;;  %s67_s22 = sadd.s32 1, %s1577_s17  ;;  %s1589_s20 = sphi %s1633_s20, %s20_s20   ;;  %s1585_s19 = sphi %s1631_s19, %s2093_s19   ;;  %s1581_s18 = sphi %s1629_s18, %s2092_s18   ;;  %s1577_s17 = sphi %s1627_s17, %s2091_s17   ;;  %s1573_s16 = sphi %s1625_s16, %s2090_s16   ;;  %s1569_s15 = sphi %s1623_s15, %s2089_s15  }
   0x7   : > { %p74_p0 = scmp.ne.s32.totalorder %s1577_s17, %s1573_s16  ;;  %p75_p1 = scmp.eq.s32.totalorder %s1589_s20, 0 }
   0x8   : > { %p80_p2 = scmp.ne.s32.totalorder %s1573_s16, %s1569_s15  ;;  %p1659_p3 = scmp.eq.s32.totalorder %s1066_s21, 0 }
   0x9   : > { %p76_p4 = por %p75_p1, %p74_p0  ;;  %p1067_p5 = scmp.ge.s32.totalorder %s1589_s20, 1 }
   0xa   : > { %s2077_s23 = scalar_select %p1659_p3, 1, 0 }
   0xb   : > { %p1666_p6 = por %p1659_p3, %p80_p2  ;;  %p164_p7 = scmp.lt.s32.totalorder %s1589_s20, 3 }
   0xc   : > { %s1591_s26 = smov [#allocation6]   ;;  %p1370_p10 = scmp.lt.s32.totalorder %s1589_s20, 2 }
   0xd   : > { %s2078_s24 = scalar_select %p1666_p6, 1, 0 }
   0xe   : > { %p1671_p8 = pnand %p1067_p5, %p164_p7  ;;  %s177_s27 = sshll.u32 %s1591_s26, 4  ;;  %s178_s27 = int_to_ptr.vmem [resolvable:$true] %s177_s27 }
   0xf   : > { %s201_s28 = sand.u32 1, %s1577_s17   ;;  %p1685_p12 = pnand %p1370_p10, %p76_p4 }
  0x10   : > { %s2079_s25 = scalar_select %p1671_p8, 1, 0 }
  0x11   : > { %p1361_p9 = pneg %p1671_p8  ;;  %s1447_s7 = scalar_lea.hbm %s2069_s2, 48 }
  0x12   : > { %s2081_s30 = scalar_select %p1685_p12, 1, 0 }
  0x13   : > { %p1681_p11 = pnand %p1361_p9, %p1659_p3  ;;  %p1448_p13 = scmp.ne.s32.totalorder %s2069_s2, %s1447_s7 }
  0x14   : > { %p1454_p5 = scmp.lt.u32.totalorder %s1447_s7, %s2069_s2 }
  0x15   : > { %p1449_p0 = pneg %p1681_p11 }
  0x17   : > { %p1450_p1 = pnand %p1449_p0, %p1448_p13 }
  0x19   : > { %p1451_p2 = pneg %p1450_p1 }
  0x1b   : > { %p1456_p4 = pnand %p1454_p5, %p1451_p2 }
  0x1d   : > { %1459 = shalt.err (!%p1456_p4)
}
  0x1e   : > { %s1460_s12 = scalar_lea.vmem %s178_s27, 48  ;;  %s1467_s13 = scalar_lea.vmem %s178_s27, 64 }
  0x1f   : > { %p1461_p7 = scmp.ne.s32.totalorder %s178_s27, %s1460_s12  ;;  %p1468_p3 = scmp.lt.s32.totalorder %s178_s27, %s178_s27 }
  0x20   : > { %p1469_p6 = scmp.lt.s32.totalorder %s1467_s13, %s1460_s12 }
  0x21   : > { %p1463_p9 = pnand %p1461_p7, %p1449_p0 }
  0x22   : > { %p1470_p8 = por %p1469_p6, %p1468_p3 }
  0x23   : > { %p1464_p10 = pneg %p1463_p9 }
  0x25   : > { %p1471_p12 = pnand %p1470_p8, %p1464_p10 }
  0x27   : > { %1474 = shalt.err (!%p1471_p12)
}
  0x28   : > { %1364 = dma.hbm_to_vmem [thread:$0]  (!%p1681_p11), %s2069_s2, 48, %s178_s27, [#allocation7]  }
  0x29   : > { %s29_s26 = sadd.s32 1, %s1585_s19  ;;  %s1348_s5 = smul.u32 1536, %s201_s28 }
  0x2a   : > { %p30_p13 = scmp.ge.s32.totalorder %s29_s26, 2  ;;  %s1349_s6 = smul.u32 24576, %s1585_s19 }
  0x2b   : > { %s205_s9 = scalar_lea.vmem [#allocation3], %s1348_s5  ;;  %s1726_s12 = scalar_lea.sflag [#allocation4], %s201_s28 }
  0x2c   : > { %s2095_s26 = smov (%p30_p13, %s29_s26), 0  ;;  %s1714_s8 = scalar_lea.hbm %s2068_s1, %s1349_s6 }
  0x2d   : > { %s213_s27 = sshll.u32 %s205_s9, 4  ;;  %s64_s10 = ssub.s32 %s1585_s19, %s2095_s26  ;;  %s1718_s27 = int_to_ptr.vmem [resolvable:$true] %s213_s27 }
  0x2e   : > { %p1720_p3 = scmp.eq.s32.totalorder %s64_s10, 0  ;;  %s1475_s13 = scalar_lea.hbm %s1714_s8, 24576 }
  0x2f   : > { %p1476_p6 = scmp.ne.s32.totalorder %s1714_s8, %s1475_s13  ;;  %p2083_p8 = scmp.ne.s32.totalorder %s2081_s30, 0 }
  0x30   : > { %s1480_s5 = scalar_lea.hbm %s2068_s1, 49152  ;;  %p1481_p1 = scmp.lt.u32.totalorder %s1714_s8, %s2068_s1 }
  0x31   : > { %p1477_p11 = pneg %p2083_p8  ;;  %p1482_p2 = scmp.lt.u32.totalorder %s1480_s5, %s1475_s13 }
  0x32   : > { %p1484_p4 = scmp.lt.u32.totalorder %s1475_s13, %s1714_s8 }
  0x33   : > { %p1478_p12 = pnand %p1477_p11, %p1476_p6  ;;  %p1483_p5 = por %p1482_p2, %p1481_p1 }
  0x35   : > { %p1479_p0 = pneg %p1478_p12  ;;  %p1485_p7 = por %p1484_p4, %p1483_p5 }
  0x37   : > { %p1486_p9 = pnand %p1485_p7, %p1479_p0 }
  0x39   : > { %1489 = shalt.err (!%p1486_p9)
}
  0x3a   : > { %s1490_s28 = scalar_lea.vmem %s1718_s27, 24576  ;;  %s1592_s29 = smov [#allocation3]  }
  0x3b   : > { %p1491_p10 = scmp.ne.s32.totalorder %s1718_s27, %s1490_s28  ;;  %s1495_s9 = sshll.u32 %s1592_s29, 4  ;;  %s1496_s9 = int_to_ptr.vmem [resolvable:$false] %s1495_s9 }
  0x3c   : > { %s1497_s10 = scalar_lea.vmem %s1496_s9, 49152  ;;  %p1498_p12 = scmp.lt.s32.totalorder %s1718_s27, %s1496_s9 }
  0x3d   : > { %p1493_p13 = pnand %p1491_p10, %p1477_p11  ;;  %p1499_p1 = scmp.lt.s32.totalorder %s1497_s10, %s1490_s28 }
  0x3f   : > { %p1494_p6 = pneg %p1493_p13  ;;  %p1500_p2 = por %p1499_p1, %p1498_p12 }
  0x41   : > { %p1501_p5 = pnand %p1500_p2, %p1494_p6 }
  0x43   : > { %1504 = shalt.err (!%p1501_p5)
}
  0x44   : > { %s1593_s13 = smov 384   ;;  %s1594_s14 = smov 24  }
  0x45   : > { %1368 = dma.hbm_to_vmem [thread:$0]  (!%p2083_p8), %s1714_s8, 24576, %s1718_s27, %s1726_s12, %s1593_s13, %s1593_s13, %s1594_s14  }
  0x46   : > { %s1759_s15 = scalar_select %p1720_p3, %s1577_s17, %s67_s22  }
  0x47   : > { %p2084_p11 = scmp.ne.s32.totalorder %s2079_s25, 0 }
  0x48   : > { %s227_s5 = sand.u32 (!%p2084_p11), 1, %s1573_s16   ;;  %p2085_p0 = scmp.ne.s32.totalorder (!%p2084_p11), %s2078_s24, 0 }
  0x49   : > { %225 = sbr.rel (%p2084_p11) target bundleno = 968 (0x3c8), region = 32  ;;  %s228_s7 = scalar_lea.sflag (!%p2084_p11), [#allocation4], %s227_s5 }
  0x4a   : > { %s1350_s6 = smul.u32 (!%p2084_p11), 1536, %s227_s5 }
  0x4c   : > { %s1764_s28 = scalar_lea.vmem (!%p2084_p11), [#allocation3], %s1350_s6 }
  0x50   : > { %1556 = dma.done.wait (%p2085_p0), %s228_s7, 24576  }
  0x51   : > { %1558 = vsyncadd (%p2085_p0), %s228_s7, 4294942720  ;;  %p2086_p8 = scmp.ne.s32.totalorder %s2077_s23, 0 }
  0x53   : > { %1560 = dma.done.wait (%p2086_p8), [#allocation7], 48  }
  0x54   : > { %1562 = vsyncadd (%p2086_p8), [#allocation7], 4294967248  ;;  %s1075_s22 = sshll.u32 %s1581_s18, 2  ;;  %p1077_p4 = scmp.ne.s32.totalorder %s1581_s18, 0 }
  0x55   : > { %p271_p3 = scmp.lt.s32.totalorder %s1075_s22, 7  ;;  %v1595_v0 = vmov (!%p1077_p4), 0.0  }
  0x56   : > { %286 = sbr.rel (%p1077_p4) target bundleno = 93 (0x5d), region = 44  ;;  %287 = vst [vmem:[#allocation2] sm:$0x3f] (!%p1077_p4), %v1595_v0 }
  0x57   : > { %s2097_s22 = smov (!%p271_p3, %s1075_s22), 7 }
  0x58   : > { %s1076_s25 = sshll.u32 %s2097_s22, 1 }
  0x59   : > { %s1778_s27 = scalar_lea.vmem %s2067_s0, %s1076_s25 }
  0x5d PF: > { %v290_v1 = vld [vmem:[%s1764_s28 + $0x8] sm:$0xff]  ;;  %v293_v2 = vld [vmem:[%s1764_s28 + $0x20] sm:$0xff]  ;;  %v292_v5 = vld [vmem:[%s1764_s28 + $0x18] sm:$0xff]  ;;  %p1078_p7 = scmp.ne.s32.totalorder %s1581_s18, 1 }
  0x5e   : > { %v289_v3 = vld [vmem:[%s1764_s28] sm:$0xff]  ;;  %v1154_v4 = vpack.c.bf16 %v293_v2, %v290_v1  ;;  %v296_v6 = vld [vmem:[%s1764_s28 + $0x38] sm:$0xff]  ;;  %v299_v7 = vld [vmem:[%s1764_s28 + $0x50] sm:$0xff]  ;;  %vm845_vm0 = vcmask (!%p1078_p7), 1041408  }
  0x5f   : > { %v1156_v8 = vpack.c.bf16 %v292_v5, %v289_v3  ;;  %v1158_v9 = vpack.c.bf16 %v299_v7, %v296_v6  ;;  %v295_v10 = vld [vmem:[%s1764_s28 + $0x30] sm:$0xff]  ;;  %v298_v11 = vld [vmem:[%s1764_s28 + $0x48] sm:$0xff]  ;;  %v305_v13 = vld [vmem:[%s1764_s28 + $0x80] sm:$0xff]  ;;  %v1596_v3 = vmov 1983009808   ;;  %v487_v5 = vlaneseq }
  0x60   : > { %v302_v12 = vld [vmem:[%s1764_s28 + $0x68] sm:$0xff]  ;;  %1155 = vmatprep.subr.bf16.mxu0 %v1154_v4  ;;  %v1160_v14 = vpack.c.bf16 %v298_v11, %v295_v10  ;;  %v301_v16 = vld [vmem:[%s1764_s28 + $0x60] sm:$0xff]  ;;  %v304_v17 = vld [vmem:[%s1764_s28 + $0x78] sm:$0xff]  ;;  %v485_v4 = vunpack.c.l.s4 %v1596_v3 }
  0x61   : > { %1157 = vmatpush1.bf16.msra.mxu0 %v1156_v8  ;;  %v1162_v15 = vpack.c.bf16 %v305_v13, %v302_v12  ;;  %v308_v18 = vld [vmem:[%s1764_s28 + $0x98] sm:$0xff]  ;;  %v311_v19 = vld [vmem:[%s1764_s28 + $0xb0] sm:$0xff]  ;;  %v1164_v20 = vpack.c.bf16 %v304_v17, %v301_v16  ;;  %v310_v23 = vld [vmem:[%s1764_s28 + $0xa8] sm:$0xff] }
  0x62   : > { %1159 = vmatprep.subr.bf16.mxu0 %v1158_v9  ;;  %v1166_v21 = vpack.c.bf16 %v311_v19, %v308_v18  ;;  %v307_v22 = vld [vmem:[%s1764_s28 + $0x90] sm:$0xff]  ;;  %v314_v24 = vld [vmem:[%s1764_s28 + $0xc8] sm:$0xff]  ;;  %v317_v25 = vld [vmem:[%s1764_s28 + $0xe0] sm:$0xff]  ;;  %v486_v18 = vunpack.c.0.s8 %v485_v4  ;;  %v1836_v19 = vshrl.u32 %v487_v5, 7 }
  0x63   : > { %v339_v26 = vld [vmem:[%s1764_s28 + $0x190] sm:$0xff]  ;;  %v342_v27 = vld [vmem:[%s1764_s28 + $0x1a8] sm:$0xff]  ;;  %v1168_v30 = vpack.c.bf16 %v310_v23, %v307_v22  ;;  %v313_v31 = vld [vmem:[%s1764_s28 + $0xc0] sm:$0xff]  ;;  %v1170_v35 = vpack.c.bf16 %v317_v25, %v314_v24 }
  0x64   : > { %v291_v28 = vld [vmem:[%s1764_s28 + $0x10] sm:$0xff]  ;;  %v294_v29 = vld [vmem:[%s1764_s28 + $0x28] sm:$0xff]  ;;  %v316_v32 = vld [vmem:[%s1764_s28 + $0xd8] sm:$0xff]  ;;  %v1282_v33 = vpack.c.bf16 %v342_v27, %v339_v26 }
  0x65   : > { %1161 = vmatpush1.bf16.msra.mxu0 %v1160_v14  ;;  %v1284_v34 = vpack.c.bf16 %v294_v29, %v291_v28  ;;  %v320_v36 = vld [vmem:[%s1764_s28 + $0xf8] sm:$0xff]  ;;  %v345_v37 = vld [vmem:[%s1764_s28 + $0x1c0] sm:$0xff]  ;;  %v323_v39 = vld [vmem:[%s1764_s28 + $0x110] sm:$0xff]  ;;  %v1172_v44 = vpack.c.bf16 %v316_v32, %v313_v31  ;;  %v1847_v32 = vsub.s32 %v486_v18, %v1836_v19 }
  0x66   : > { %1163 = vmatprep.subr.bf16.mxu0 %v1162_v15  ;;  %v348_v38 = vld [vmem:[%s1764_s28 + $0x1d8] sm:$0xff]  ;;  %1283 = vmatprep.subr.bf16.mxu1 %v1282_v33  ;;  %v297_v41 = vld [vmem:[%s1764_s28 + $0x40] sm:$0xff]  ;;  %v351_v45 = vld [vmem:[%s1764_s28 + $0x1f0] sm:$0xff]  ;;  %v1174_v48 = vpack.c.bf16 %v323_v39, %v320_v36 }
  0x67   : > { %v1286_v40 = vpack.c.bf16 %v348_v38, %v345_v37  ;;  %v300_v42 = vld [vmem:[%s1764_s28 + $0x58] sm:$0xff]  ;;  %1285 = vmatpush3.bf16.msra.mxu1 %v1284_v34  ;;  %v354_v46 = vld [vmem:[%s1764_s28 + $0x208] sm:$0xff]  ;;  %v303_v47 = vld [vmem:[%s1764_s28 + $0x70] sm:$0xff] }
  0x68   : > { %v1288_v43 = vpack.c.bf16 %v300_v42, %v297_v41  ;;  %v319_v49 = vld [vmem:[%s1764_s28 + $0xf0] sm:$0xff]  ;;  %v322_v50 = vld [vmem:[%s1764_s28 + $0x108] sm:$0xff]  ;;  %v1290_v51 = vpack.c.bf16 %v354_v46, %v351_v45  ;;  %v329_v54 = vld [vmem:[%s1764_s28 + $0x140] sm:$0xff] }
  0x69   : > { %1165 = vmatpush1.bf16.msra.mxu0 %v1164_v20  ;;  %1287 = vmatprep.subr.bf16.mxu1 %v1286_v40  ;;  %v306_v52 = vld [vmem:[%s1764_s28 + $0x88] sm:$0xff]  ;;  %v357_v55 = vld [vmem:[%s1764_s28 + $0x220] sm:$0xff]  ;;  %v360_v57 = vld [vmem:[%s1764_s28 + $0x238] sm:$0xff]  ;;  %v1176_v58 = vpack.c.bf16 %v322_v50, %v319_v49 }
  0x6a   : > { %1167 = vmatprep.subr.bf16.mxu0 %v1166_v21  ;;  %v326_v53 = vld [vmem:[%s1764_s28 + $0x128] sm:$0xff]  ;;  %v1292_v56 = vpack.c.bf16 %v306_v52, %v303_v47  ;;  %v325_v59 = vld [vmem:[%s1764_s28 + $0x120] sm:$0xff]  ;;  %v1294_v60 = vpack.c.bf16 %v360_v57, %v357_v55  ;;  %v312_v62 = vld [vmem:[%s1764_s28 + $0xb8] sm:$0xff] }
  0x6b   : > { %1289 = vmatpush3.bf16.msra.mxu1 %v1288_v43  ;;  %v309_v61 = vld [vmem:[%s1764_s28 + $0xa0] sm:$0xff]  ;;  %v1178_v63 = vpack.c.bf16 %v329_v54, %v326_v53  ;;  %v328_v0 = vld [vmem:[%s1764_s28 + $0x138] sm:$0xff]  ;;  %v363_v1 = vld [vmem:[%s1764_s28 + $0x250] sm:$0xff] }
  0x6c   : > { %1291 = vmatprep.subr.bf16.mxu1 %v1290_v51  ;;  %v366_v2 = vld [vmem:[%s1764_s28 + $0x268] sm:$0xff]  ;;  %v332_v6 = vld [vmem:[%s1764_s28 + $0x158] sm:$0xff]  ;;  %v335_v7 = vld [vmem:[%s1764_s28 + $0x170] sm:$0xff]  ;;  %v1296_v8 = vpack.c.bf16 %v312_v62, %v309_v61  ;;  %v1180_v9 = vpack.c.bf16 %v328_v0, %v325_v59 }
  0x6d   : > { %1169 = vmatpush1.bf16.msra.mxu0 %v1168_v30  ;;  %v331_v10 = vld [vmem:[%s1764_s28 + $0x150] sm:$0xff]  ;;  %v1298_v11 = vpack.c.bf16 %v366_v2, %v363_v1  ;;  %v318_v13 = vld [vmem:[%s1764_s28 + $0xe8] sm:$0xff]  ;;  %v1182_v14 = vpack.c.bf16 %v335_v7, %v332_v6  ;;  %v369_v16 = vld [vmem:[%s1764_s28 + $0x280] sm:$0xff] }
  0x6e   : > { %1171 = vmatprep.subr.bf16.mxu0 %v1170_v35  ;;  %v315_v12 = vld [vmem:[%s1764_s28 + $0xd0] sm:$0xff]  ;;  %v334_v15 = vld [vmem:[%s1764_s28 + $0x168] sm:$0xff]  ;;  %v372_v17 = vld [vmem:[%s1764_s28 + $0x298] sm:$0xff] }
  0x6f   : > { %1293 = vmatpush3.bf16.msra.mxu1 %v1292_v56  ;;  %v338_v20 = vld [vmem:[%s1764_s28 + $0x188] sm:$0xff]  ;;  %v341_v21 = vld [vmem:[%s1764_s28 + $0x1a0] sm:$0xff]  ;;  %v1300_v22 = vpack.c.bf16 %v318_v13, %v315_v12  ;;  %v1184_v23 = vpack.c.bf16 %v334_v15, %v331_v10  ;;  %v1302_v25 = vpack.c.bf16 %v372_v17, %v369_v16  ;;  %v324_v27 = vld [vmem:[%s1764_s28 + $0x118] sm:$0xff] }
  0x70   : > { %1295 = vmatprep.subr.bf16.mxu1 %v1294_v60  ;;  %v337_v24 = vld [vmem:[%s1764_s28 + $0x180] sm:$0xff]  ;;  %v1186_v28 = vpack.c.bf16 %v341_v21, %v338_v20  ;;  %v340_v29 = vld [vmem:[%s1764_s28 + $0x198] sm:$0xff]  ;;  %v375_v30 = vld [vmem:[%s1764_s28 + $0x2b0] sm:$0xff] }
  0x71   : > { %1173 = vmatpush1.bf16.msra.mxu0 %v1172_v44  ;;  %v321_v26 = vld [vmem:[%s1764_s28 + $0x100] sm:$0xff]  ;;  %v378_v31 = vld [vmem:[%s1764_s28 + $0x2c8] sm:$0xff]  ;;  %v344_v33 = vld [vmem:[%s1764_s28 + $0x1b8] sm:$0xff]  ;;  %v1188_v37 = vpack.c.bf16 %v340_v29, %v337_v24 }
  0x72   : > { %1175 = vmatprep.subr.bf16.mxu0 %v1174_v48  ;;  %v347_v34 = vld [vmem:[%s1764_s28 + $0x1d0] sm:$0xff]  ;;  %v1304_v36 = vpack.c.bf16 %v324_v27, %v321_v26  ;;  %v1306_v38 = vpack.c.bf16 %v378_v31, %v375_v30  ;;  %v330_v40 = vld [vmem:[%s1764_s28 + $0x148] sm:$0xff]  ;;  %v288_v41 = vld [vmem:[%s1778_s27] sm:$0xff] }
  0x73   : > { %1297 = vmatpush3.bf16.msra.mxu1 %v1296_v8  ;;  %v343_v35 = vld [vmem:[%s1764_s28 + $0x1b0] sm:$0xff]  ;;  %v1190_v42 = vpack.c.bf16 %v347_v34, %v344_v33  ;;  %v346_v43 = vld [vmem:[%s1764_s28 + $0x1c8] sm:$0xff]  ;;  %v381_v44 = vld [vmem:[%s1764_s28 + $0x2e0] sm:$0xff]  ;;  %v1859_v46 = vrot.slane %v288_v41, %v1847_v32  ;;  %v483_v50 = vcombine.high %v288_v41, %v288_v41 }
  0x74   : > { %1299 = vmatprep.subr.bf16.mxu1 %v1298_v11  ;;  %v327_v39 = vld [vmem:[%s1764_s28 + $0x130] sm:$0xff]  ;;  %v384_v45 = vld [vmem:[%s1764_s28 + $0x2f8] sm:$0xff]  ;;  %v350_v47 = vld [vmem:[%s1764_s28 + $0x1e8] sm:$0xff]  ;;  %v1192_v52 = vpack.c.bf16 %v346_v43, %v343_v35 }
  0x75   : > { %1177 = vmatpush1.bf16.msra.mxu0 %v1176_v58  ;;  %v353_v48 = vld [vmem:[%s1764_s28 + $0x200] sm:$0xff]  ;;  %v1308_v49 = vpack.c.bf16 %v330_v40, %v327_v39  ;;  %v498_v51 = vcombine.high %v1859_v46, %v1859_v46  ;;  %v1310_v54 = vpack.c.bf16 %v384_v45, %v381_v44  ;;  %v336_v56 = vld [vmem:[%s1764_s28 + $0x178] sm:$0xff]  ;;  %v435_v59 = vld [vmem:[%s1764_s28 + $0x490] sm:$0xff]  ;;  %v1874_v0 = vrot.slane %v483_v50, %v1847_v32 }
  0x76   : > { %1179 = vmatprep.subr.bf16.mxu0 %v1178_v63  ;;  %v349_v53 = vld [vmem:[%s1764_s28 + $0x1e0] sm:$0xff]  ;;  %v1194_v57 = vpack.c.bf16 %v353_v48, %v350_v47  ;;  %v352_v58 = vld [vmem:[%s1764_s28 + $0x1f8] sm:$0xff]  ;;  %v438_v60 = vld [vmem:[%s1764_s28 + $0x4a8] sm:$0xff] }
  0x77   : > { %1301 = vmatpush3.bf16.msra.mxu1 %v1300_v22  ;;  %v333_v55 = vld [vmem:[%s1764_s28 + $0x160] sm:$0xff]  ;;  %710 = vmatprep.mubr.f32.mxu1 %v498_v51  ;;  %v356_v61 = vld [vmem:[%s1764_s28 + $0x218] sm:$0xff]  ;;  %v359_v62 = vld [vmem:[%s1764_s28 + $0x230] sm:$0xff]  ;;  %v1196_v1 = vpack.c.bf16 %v352_v58, %v349_v53  ;;  %v1314_v3 = vpack.c.bf16 %v438_v60, %v435_v59 }
  0x78   : > { %1303 = vmatprep.subr.bf16.mxu1 %v1302_v25  ;;  %568 = vmatprep.mubr.f32.mxu0 %v498_v51  ;;  %v1312_v63 = vpack.c.bf16 %v336_v56, %v333_v55  ;;  %v355_v2 = vld [vmem:[%s1764_s28 + $0x210] sm:$0xff]  ;;  %v390_v6 = vld [vmem:[%s1764_s28 + $0x328] sm:$0xff]  ;;  %v1198_v7 = vpack.c.bf16 %v359_v62, %v356_v61  ;;  %v444_v10 = vld [vmem:[%s1764_s28 + $0x4d8] sm:$0xff] }
  0x79   : > { %1181 = vmatpush1.bf16.msra.mxu0 %v1180_v9  ;;  %v387_v4 = vld [vmem:[%s1764_s28 + $0x310] sm:$0xff]  ;;  %v358_v8 = vld [vmem:[%s1764_s28 + $0x228] sm:$0xff]  ;;  %v441_v9 = vld [vmem:[%s1764_s28 + $0x4c0] sm:$0xff] }
  0x7a   : > { %1183 = vmatprep.subr.bf16.mxu0 %v1182_v14  ;;  %v362_v11 = vld [vmem:[%s1764_s28 + $0x248] sm:$0xff]  ;;  %v365_v12 = vld [vmem:[%s1764_s28 + $0x260] sm:$0xff]  ;;  %v1316_v13 = vpack.c.bf16 %v390_v6, %v387_v4  ;;  %v1886_v14 = vcombine.high %v1874_v0, %v1874_v0  ;;  %v1200_v15 = vpack.c.bf16 %v358_v8, %v355_v2  ;;  %v1318_v17 = vpack.c.bf16 %v444_v10, %v441_v9  ;;  %v396_v20 = vld [vmem:[%s1764_s28 + $0x358] sm:$0xff] }
  0x7b   : > { %1305 = vmatpush3.bf16.msra.mxu1 %v1304_v36  ;;  %v361_v16 = vld [vmem:[%s1764_s28 + $0x240] sm:$0xff]  ;;  %v1202_v21 = vpack.c.bf16 %v365_v12, %v362_v11  ;;  %v364_v22 = vld [vmem:[%s1764_s28 + $0x258] sm:$0xff]  ;;  %v450_v24 = vld [vmem:[%s1764_s28 + $0x508] sm:$0xff] }
  0x7c   : > { %1307 = vmatprep.subr.bf16.mxu1 %v1306_v38  ;;  %v393_v18 = vld [vmem:[%s1764_s28 + $0x340] sm:$0xff]  ;;  %v368_v25 = vld [vmem:[%s1764_s28 + $0x278] sm:$0xff]  ;;  %v371_v26 = vld [vmem:[%s1764_s28 + $0x290] sm:$0xff] }
  0x7d   : > { %1185 = vmatpush1.bf16.msra.mxu0 %v1184_v23  ;;  %v447_v23 = vld [vmem:[%s1764_s28 + $0x4f0] sm:$0xff]  ;;  %v1320_v27 = vpack.c.bf16 %v396_v20, %v393_v18  ;;  %v402_v33 = vld [vmem:[%s1764_s28 + $0x388] sm:$0xff]  ;;  %v1206_v34 = vpack.c.bf16 %v371_v26, %v368_v25  ;;  %v453_v36 = vld [vmem:[%s1764_s28 + $0x520] sm:$0xff] }
  0x7e   : > { %1187 = vmatprep.subr.bf16.mxu0 %v1186_v28  ;;  %v1204_v28 = vpack.c.bf16 %v364_v22, %v361_v16  ;;  %v367_v29 = vld [vmem:[%s1764_s28 + $0x270] sm:$0xff]  ;;  %v1322_v30 = vpack.c.bf16 %v450_v24, %v447_v23  ;;  %v370_v35 = vld [vmem:[%s1764_s28 + $0x288] sm:$0xff]  ;;  %v377_v39 = vld [vmem:[%s1764_s28 + $0x2c0] sm:$0xff] }
  0x7f   : > { %1309 = vmatpush3.bf16.msra.mxu1 %v1308_v49  ;;  %v399_v31 = vld [vmem:[%s1764_s28 + $0x370] sm:$0xff]  ;;  %v374_v38 = vld [vmem:[%s1764_s28 + $0x2a8] sm:$0xff]  ;;  %v1208_v41 = vpack.c.bf16 %v370_v35, %v367_v29  ;;  %v405_v44 = vld [vmem:[%s1764_s28 + $0x3a0] sm:$0xff] }
  0x80   : > { %1311 = vmatprep.subr.bf16.mxu1 %v1310_v54  ;;  %v1324_v40 = vpack.c.bf16 %v402_v33, %v399_v31  ;;  %v408_v45 = vld [vmem:[%s1764_s28 + $0x3b8] sm:$0xff]  ;;  %v1210_v47 = vpack.c.bf16 %v377_v39, %v374_v38  ;;  %v459_v49 = vld [vmem:[%s1764_s28 + $0x550] sm:$0xff]  ;;  %v462_v50 = vld [vmem:[%s1764_s28 + $0x568] sm:$0xff] }
  0x81   : > { %1189 = vmatpush1.bf16.msra.mxu0 %v1188_v37  ;;  %v456_v37 = vld [vmem:[%s1764_s28 + $0x538] sm:$0xff]  ;;  %v1328_v53 = vpack.c.bf16 %v408_v45, %v405_v44  ;;  %v379_v55 = vld [vmem:[%s1764_s28 + $0x2d0] sm:$0xff]  ;;  %v1330_v56 = vpack.c.bf16 %v462_v50, %v459_v49  ;;  %v414_v58 = vld [vmem:[%s1764_s28 + $0x3e8] sm:$0xff] }
  0x82   : > { %1191 = vmatprep.subr.bf16.mxu0 %v1190_v42  ;;  %v373_v42 = vld [vmem:[%s1764_s28 + $0x2a0] sm:$0xff]  ;;  %v1326_v43 = vpack.c.bf16 %v456_v37, %v453_v36  ;;  %v376_v48 = vld [vmem:[%s1764_s28 + $0x2b8] sm:$0xff]  ;;  %v382_v60 = vld [vmem:[%s1764_s28 + $0x2e8] sm:$0xff] }
  0x83   : > { %1313 = vmatpush3.bf16.msra.mxu1 %v1312_v63  ;;  %v380_v51 = vld [vmem:[%s1764_s28 + $0x2d8] sm:$0xff]  ;;  %v1212_v54 = vpack.c.bf16 %v376_v48, %v373_v42  ;;  %v465_v61 = vld [vmem:[%s1764_s28 + $0x580] sm:$0xff]  ;;  %v386_v63 = vld [vmem:[%s1764_s28 + $0x308] sm:$0xff] }
  0x84   : > { %1315 = vmatprep.subr.bf16.mxu1 %v1314_v3  ;;  %v468_v62 = vld [vmem:[%s1764_s28 + $0x598] sm:$0xff]  ;;  %v1216_v3 = vpack.c.bf16 %v382_v60, %v379_v55  ;;  %v385_v4 = vld [vmem:[%s1764_s28 + $0x300] sm:$0xff]  ;;  %v471_v11 = vld [vmem:[%s1764_s28 + $0x5b0] sm:$0xff] }
  0x85   : > { %1193 = vmatpush1.bf16.msra.mxu0 %v1192_v52  ;;  %v383_v52 = vld [vmem:[%s1764_s28 + $0x2f0] sm:$0xff]  ;;  %v1334_v6 = vpack.c.bf16 %v468_v62, %v465_v61  ;;  %v420_v8 = vld [vmem:[%s1764_s28 + $0x418] sm:$0xff]  ;;  %v474_v12 = vld [vmem:[%s1764_s28 + $0x5c8] sm:$0xff] }
  0x86   : > { %1195 = vmatprep.subr.bf16.mxu0 %v1194_v57  ;;  %711 = vmatmul.mubr.f32.vlgmr.msra.gmra.mrb[0].mxu1 %v1859_v46  ;;  %v411_v57 = vld [vmem:[%s1764_s28 + $0x3d0] sm:$0xff]  ;;  %v1214_v59 = vpack.c.bf16 %v383_v52, %v380_v51  ;;  %v388_v10 = vld [vmem:[%s1764_s28 + $0x318] sm:$0xff]  ;;  %v1338_v20 = vpack.c.bf16 %v474_v12, %v471_v11  ;;  %v426_v22 = vld [vmem:[%s1764_s28 + $0x448] sm:$0xff] }
  0x87   : > { %1317 = vmatpush3.bf16.msra.mxu1 %v1316_v13  ;;  %780 = vmatprep.mubr.f32.mxu1 %v1886_v14  ;;  %v1332_v2 = vpack.c.bf16 %v414_v58, %v411_v57  ;;  %v392_v13 = vld [vmem:[%s1764_s28 + $0x338] sm:$0xff]  ;;  %v391_v18 = vld [vmem:[%s1764_s28 + $0x330] sm:$0xff]  ;;  %v394_v24 = vld [vmem:[%s1764_s28 + $0x348] sm:$0xff] }
  0x88   : > { %1319 = vmatprep.subr.bf16.mxu1 %v1318_v17  ;;  %v1220_v17 = vpack.c.bf16 %v388_v10, %v385_v4  ;;  %v477_v25 = vld [vmem:[%s1764_s28 + $0x5e0] sm:$0xff]  ;;  %v480_v26 = vld [vmem:[%s1764_s28 + $0x5f8] sm:$0xff]  ;;  %v403_v42 = vld [vmem:[%s1764_s28 + $0x390] sm:$0xff] }
  0x89   : > { %1197 = vmatpush1.bf16.msra.mxu0 %v1196_v1  ;;  %v389_v1 = vld [vmem:[%s1764_s28 + $0x320] sm:$0xff]  ;;  %v1342_v31 = vpack.c.bf16 %v480_v26, %v477_v25  ;;  %v400_v37 = vld [vmem:[%s1764_s28 + $0x378] sm:$0xff]  ;;  %v410_v44 = vld [vmem:[%s1764_s28 + $0x3c8] sm:$0xff] }
  0x8a   : > { %1199 = vmatprep.subr.bf16.mxu0 %v1198_v7  ;;  %v417_v7 = vld [vmem:[%s1764_s28 + $0x400] sm:$0xff]  ;;  %v1218_v9 = vpack.c.bf16 %v389_v1, %v386_v63  ;;  %v404_v38 = vld [vmem:[%s1764_s28 + $0x398] sm:$0xff]  ;;  %v419_v51 = vld [vmem:[%s1764_s28 + $0x410] sm:$0xff] }
  0x8b   : > { %1321 = vmatpush3.bf16.msra.mxu1 %v1320_v27  ;;  %v1336_v16 = vpack.c.bf16 %v420_v8, %v417_v7  ;;  %v398_v27 = vld [vmem:[%s1764_s28 + $0x368] sm:$0xff]  ;;  %v429_v33 = vld [vmem:[%s1764_s28 + $0x460] sm:$0xff]  ;;  %v412_v49 = vld [vmem:[%s1764_s28 + $0x3d8] sm:$0xff] }
  0x8c   : > { %1323 = vmatprep.subr.bf16.mxu1 %v1322_v30  ;;  %v1224_v30 = vpack.c.bf16 %v394_v24, %v391_v18  ;;  %v397_v36 = vld [vmem:[%s1764_s28 + $0x360] sm:$0xff]  ;;  %v416_v50 = vld [vmem:[%s1764_s28 + $0x3f8] sm:$0xff]  ;;  %v418_v55 = vld [vmem:[%s1764_s28 + $0x408] sm:$0xff] }
  0x8d   : > { %1201 = vmatpush1.bf16.msra.mxu0 %v1200_v15  ;;  %v395_v15 = vld [vmem:[%s1764_s28 + $0x350] sm:$0xff]  ;;  %v413_v45 = vld [vmem:[%s1764_s28 + $0x3e0] sm:$0xff]  ;;  %v424_v61 = vld [vmem:[%s1764_s28 + $0x438] sm:$0xff] }
  0x8e   : > { %1203 = vmatprep.subr.bf16.mxu0 %v1202_v21  ;;  %v423_v21 = vld [vmem:[%s1764_s28 + $0x430] sm:$0xff]  ;;  %v1222_v23 = vpack.c.bf16 %v395_v15, %v392_v13  ;;  %v409_v48 = vld [vmem:[%s1764_s28 + $0x3c0] sm:$0xff]  ;;  %v428_v62 = vld [vmem:[%s1764_s28 + $0x458] sm:$0xff] }
  0x8f   : > { %1325 = vmatpush3.bf16.msra.mxu1 %v1324_v40  ;;  %v1340_v29 = vpack.c.bf16 %v426_v22, %v423_v21  ;;  %v1228_v40 = vpack.c.bf16 %v400_v37, %v397_v36  ;;  %v1236_v52 = vpack.c.bf16 %v412_v49, %v409_v48  ;;  %v425_v57 = vld [vmem:[%s1764_s28 + $0x440] sm:$0xff]  ;;  %v431_v63 = vld [vmem:[%s1764_s28 + $0x470] sm:$0xff]  ;;  %v430_v4 = vld [vmem:[%s1764_s28 + $0x468] sm:$0xff] }
  0x90   : > { %1327 = vmatprep.subr.bf16.mxu1 %v1326_v43  ;;  %v406_v43 = vld [vmem:[%s1764_s28 + $0x3a8] sm:$0xff]  ;;  %v421_v60 = vld [vmem:[%s1764_s28 + $0x420] sm:$0xff]  ;;  %v436_v11 = vld [vmem:[%s1764_s28 + $0x498] sm:$0xff] }
  0x91   : > { %1205 = vmatpush1.bf16.msra.mxu0 %v1204_v28  ;;  %v401_v28 = vld [vmem:[%s1764_s28 + $0x380] sm:$0xff]  ;;  %v1244_v1 = vpack.c.bf16 %v424_v61, %v421_v60  ;;  %v440_v12 = vld [vmem:[%s1764_s28 + $0x4b8] sm:$0xff]  ;;  %v443_v13 = vld [vmem:[%s1764_s28 + $0x4d0] sm:$0xff] }
  0x92   : > { %1207 = vmatprep.subr.bf16.mxu0 %v1206_v34  ;;  %v432_v34 = vld [vmem:[%s1764_s28 + $0x478] sm:$0xff]  ;;  %v1226_v35 = vpack.c.bf16 %v401_v28, %v398_v27  ;;  %v437_v7 = vld [vmem:[%s1764_s28 + $0x4a0] sm:$0xff]  ;;  %v442_v18 = vld [vmem:[%s1764_s28 + $0x4c8] sm:$0xff] }
  0x93   : > { %1329 = vmatpush3.bf16.msra.mxu1 %v1328_v53  ;;  %v1344_v39 = vpack.c.bf16 %v432_v34, %v429_v33  ;;  %v1238_v53 = vpack.c.bf16 %v419_v51, %v416_v50  ;;  %v433_v10 = vld [vmem:[%s1764_s28 + $0x480] sm:$0xff]  ;;  %v448_v25 = vld [vmem:[%s1764_s28 + $0x4f8] sm:$0xff]  ;;  %v455_v27 = vld [vmem:[%s1764_s28 + $0x530] sm:$0xff] }
  0x94   : > { %1331 = vmatprep.subr.bf16.mxu1 %v1330_v56  ;;  %v422_v56 = vld [vmem:[%s1764_s28 + $0x428] sm:$0xff]  ;;  %v1252_v15 = vpack.c.bf16 %v436_v11, %v433_v10  ;;  %v449_v21 = vld [vmem:[%s1764_s28 + $0x500] sm:$0xff]  ;;  %v452_v26 = vld [vmem:[%s1764_s28 + $0x518] sm:$0xff]  ;;  %v817_v10 = vsub.s32 (!%p1078_p7), 0, %v1836_v19  ;;  %v821_v11 = vsub.s32 (!%p1078_p7), 1, %v1836_v19 }
  0x95   : > { %1209 = vmatpush1.bf16.msra.mxu0 %v1208_v41  ;;  %v445_v24 = vld [vmem:[%s1764_s28 + $0x4e0] sm:$0xff]  ;;  %v458_v33 = vld [vmem:[%s1764_s28 + $0x548] sm:$0xff]  ;;  %v472_v49 = vld [vmem:[%s1764_s28 + $0x5b8] sm:$0xff] }
  0x96   : > { %1211 = vmatprep.subr.bf16.mxu0 %v1210_v47  ;;  %v1234_v47 = vpack.c.bf16 %v413_v45, %v410_v44  ;;  %v1260_v28 = vpack.c.bf16 %v448_v25, %v445_v24  ;;  %v461_v34 = vld [vmem:[%s1764_s28 + $0x560] sm:$0xff]  ;;  %v470_v44 = vld [vmem:[%s1764_s28 + $0x5a8] sm:$0xff]  ;;  %v476_v50 = vld [vmem:[%s1764_s28 + $0x5d8] sm:$0xff] }
  0x97   : > { %1333 = vmatpush3.bf16.msra.mxu1 %v1332_v2  ;;  %v1246_v2 = vpack.c.bf16 %v431_v63, %v428_v62  ;;  %v1266_v36 = vpack.c.bf16 %v461_v34, %v458_v33  ;;  %v457_v37 = vld [vmem:[%s1764_s28 + $0x540] sm:$0xff]  ;;  %v479_v51 = vld [vmem:[%s1764_s28 + $0x5f0] sm:$0xff]  ;;  %v933_v34 = vand.u32 (!%p1078_p7), 127, %v487_v5 }
  0x98   : > { %1335 = vmatprep.subr.bf16.mxu1 %v1334_v6  ;;  %v434_v6 = vld [vmem:[%s1764_s28 + $0x488] sm:$0xff]  ;;  %v473_v45 = vld [vmem:[%s1764_s28 + $0x5c0] sm:$0xff] }
  0x99   : > { %1213 = vmatpush1.bf16.msra.mxu0 %v1212_v54  ;;  %v415_v54 = vld [vmem:[%s1764_s28 + $0x3f0] sm:$0xff]  ;;  %v469_v48 = vld [vmem:[%s1764_s28 + $0x5a0] sm:$0xff]  ;;  %vm934_vm1 = vcmp.lt.s32.totalorder (!%p1078_p7), %v933_v34, 8 }
  0x9a   : > { %1215 = vmatprep.subr.bf16.mxu0 %v1214_v59  ;;  %v1240_v58 = vpack.c.bf16 %v418_v55, %v415_v54  ;;  %v1242_v59 = vpack.c.bf16 %v425_v57, %v422_v56  ;;  %v475_v54 = vld [vmem:[%s1764_s28 + $0x5d0] sm:$0xff]  ;;  %v478_v55 = vld [vmem:[%s1764_s28 + $0x5e8] sm:$0xff] }
  0x9b   : > { %1337 = vmatpush3.bf16.msra.mxu1 %v1336_v16  ;;  %v1254_v16 = vpack.c.bf16 %v443_v13, %v440_v12  ;;  %v1280_v56 = vpack.c.bf16 %v478_v55, %v475_v54  ;;  %v825_v12 = vsub.s32 (!%p1078_p7), 2, %v1836_v19 }
  0x9c   : > { %1339 = vmatprep.subr.bf16.mxu1 %v1338_v20  ;;  %v446_v20 = vld [vmem:[%s1764_s28 + $0x4e8] sm:$0xff] }
  0x9d   : > { %1217 = vmatpush1.bf16.msra.mxu0 %v1216_v3  ;;  %v427_v3 = vld [vmem:[%s1764_s28 + $0x450] sm:$0xff] }
  0x9e   : > { %1219 = vmatprep.subr.bf16.mxu0 %v1218_v9  ;;  %v1248_v8 = vpack.c.bf16 %v430_v4, %v427_v3  ;;  %v1250_v9 = vpack.c.bf16 %v437_v7, %v434_v6  ;;  %v481_v7 = vld [vmem:[#allocation2] sm:$0x3f] }
  0x9f   : > { %1341 = vmatpush3.bf16.msra.mxu1 %v1340_v29  ;;  %v1262_v29 = vpack.c.bf16 %v455_v27, %v452_v26 }
  0xa0   : > { %569 = vmatmul.mubr.f32.vlgmr.msra.gmra.mrb[0].mxu0 %v1859_v46  ;;  %v407_v46 = vld [vmem:[%s1764_s28 + $0x3b0] sm:$0xff]  ;;  %1343 = vmatprep.subr.bf16.mxu1 %v1342_v31  ;;  %v454_v31 = vld [vmem:[%s1764_s28 + $0x528] sm:$0xff] }
  0xa1   : > { %1221 = vmatpush1.bf16.msra.mxu0 %v1220_v17  ;;  %639 = vmatprep.mubr.f32.mxu0 %v1886_v14  ;;  %v1230_v41 = vpack.c.bf16 %v407_v46, %v404_v38  ;;  %v1232_v14 = vpack.c.bf16 %v406_v43, %v403_v42  ;;  %v439_v17 = vld [vmem:[%s1764_s28 + $0x4b0] sm:$0xff]  ;;  %v460_v38 = vld [vmem:[%s1764_s28 + $0x558] sm:$0xff]  ;;  %v466_v43 = vld [vmem:[%s1764_s28 + $0x588] sm:$0xff] }
  0xa2   : > { %1223 = vmatprep.subr.bf16.mxu0 %v1222_v23  ;;  %v1256_v22 = vpack.c.bf16 %v442_v18, %v439_v17  ;;  %v1258_v23 = vpack.c.bf16 %v449_v21, %v446_v20  ;;  %v464_v46 = vld [vmem:[%s1764_s28 + $0x578] sm:$0xff]  ;;  %v463_v42 = vld [vmem:[%s1764_s28 + $0x570] sm:$0xff] }
  0xa3   : > { %1345 = vmatpush3.bf16.msra.mxu1 %v1344_v39  ;;  %v467_v39 = vld [vmem:[%s1764_s28 + $0x590] sm:$0xff] }
  0xa5   : > { %1225 = vmatpush1.bf16.msra.mxu0 %v1224_v30  ;;  %v451_v30 = vld [vmem:[%s1764_s28 + $0x510] sm:$0xff] }
  0xa6   : > { %1227 = vmatprep.subr.bf16.mxu0 %v1226_v35  ;;  %781 = vmatmul.mubr.f32.vlgmr.msra.gmra.mrb[2].mxu1 %v1874_v0  ;;  %v1264_v35 = vpack.c.bf16 %v454_v31, %v451_v30 }
  0xa9   : > { %1229 = vmatpush1.bf16.msra.mxu0 %v1228_v40  ;;  %v1268_v40 = vpack.c.bf16 %v460_v38, %v457_v37 }
  0xaa   : > { %1231 = vmatprep.subr.bf16.mxu0 %v1230_v41  ;;  %v1270_v41 = vpack.c.bf16 %v467_v39, %v464_v46 }
  0xad   : > { %1233 = vmatpush1.bf16.msra.mxu0 %v1232_v14  ;;  %v1272_v14 = vpack.c.bf16 %v466_v43, %v463_v42 }
  0xae   : > { %1235 = vmatprep.subr.bf16.mxu0 %v1234_v47  ;;  %v1274_v47 = vpack.c.bf16 %v473_v45, %v470_v44 }
  0xb1   : > { %1237 = vmatpush1.bf16.msra.mxu0 %v1236_v52  ;;  %v1276_v52 = vpack.c.bf16 %v472_v49, %v469_v48 }
  0xb2   : > { %1239 = vmatprep.subr.bf16.mxu0 %v1238_v53  ;;  %v1278_v53 = vpack.c.bf16 %v479_v51, %v476_v50 }
  0xb5   : > { %1241 = vmatpush1.bf16.msra.mxu0 %v1240_v58 }
  0xb6   : > { %1243 = vmatprep.subr.bf16.mxu0 %v1242_v59 }
  0xb9   : > { %1245 = vmatpush1.bf16.msra.mxu0 %v1244_v1 }
  0xba   : > { %1247 = vmatprep.subr.bf16.mxu0 %v1246_v2 }
  0xbd   : > { %1249 = vmatpush1.bf16.msra.mxu0 %v1248_v8 }
  0xbe   : > { %1251 = vmatprep.subr.bf16.mxu0 %v1250_v9 }
  0xc1   : > { %1253 = vmatpush1.bf16.msra.mxu0 %v1252_v15 }
  0xc2   : > { %1255 = vmatprep.subr.bf16.mxu0 %v1254_v16 }
  0xc5   : > { %1257 = vmatpush1.bf16.msra.mxu0 %v1256_v22 }
  0xc6   : > { %1259 = vmatprep.subr.bf16.mxu0 %v1258_v23 }
  0xc9   : > { %1261 = vmatpush1.bf16.msra.mxu0 %v1260_v28 }
  0xca   : > { %1263 = vmatprep.subr.bf16.mxu0 %v1262_v29 }
  0xcd   : > { %1265 = vmatpush1.bf16.msra.mxu0 %v1264_v35 }
  0xce   : > { %1267 = vmatprep.subr.bf16.mxu0 %v1266_v36 }
  0xd1   : > { %1269 = vmatpush1.bf16.msra.mxu0 %v1268_v40 }
  0xd2   : > { %1271 = vmatprep.subr.bf16.mxu0 %v1270_v41 }
  0xd5   : > { %1273 = vmatpush1.bf16.msra.mxu0 %v1272_v14 }
  0xd6   : > { %1275 = vmatprep.subr.bf16.mxu0 %v1274_v47 }
  0xd9   : > { %1277 = vmatpush1.bf16.msra.mxu0 %v1276_v52 }
  0xda   : > { %1279 = vmatprep.subr.bf16.mxu0 %v1278_v53 }
  0xdd   : > { %1281 = vmatpush1.bf16.msra.mxu0 %v1280_v56 }
  0xe0   : > { %640 = vmatmul.mubr.f32.vlgmr.msra.gmra.mrb[0].mxu0 %v1874_v0  ;;  %v813_v0 = vld [vmem:[#allocation6] sm:$0x7] (!%p1078_p7) }
  0xe1   : > { %v818_v13 = vrot.slane (!%p1078_p7), %v813_v0, %v817_v10  ;;  %v822_v15 = vrot.slane (!%p1078_p7), %v813_v0, %v821_v11  ;;  %v826_v16 = vrot.slane (!%p1078_p7), %v813_v0, %v825_v12 }
  0xe3   : > { %v827_v17 = vcombine.low (!%p1078_p7), %v818_v13, %v822_v15  ;;  %v841_v18 = vrot.slane (!%p1078_p7), %v826_v16, %v1847_v32 }
  0xe5   : > { %v834_v20 = vrot.slane (!%p1078_p7), %v827_v17, %v1847_v32 }
  0xe7   : > { %v842_v22 = vcombine.low (!%p1078_p7), %v834_v20, %v841_v18 }
 0x159   : > { %v1116_v57 = vpop.f32.mrb[0].mxu1 }
 0x15a   : > { %v1117_v58 = vpop.f32.mrb[1].mxu1 }
 0x15b   : > { %v1118_v59 = vadd.f32 %v1117_v58, %v1116_v57 }
 0x179   : > { %v1151_v60 = vpop.f32.mrb[2].mxu1 }
 0x17a   : > { %v1152_v61 = vpop.f32.mrb[3].mxu1 }
 0x17b   : > { %v1153_v62 = vadd.f32 %v1152_v61, %v1151_v60 }
 0x17d   : > { %v783_v63 = vadd.f32 %v1153_v62, %v1118_v59 }
 0x17f   : > { %v803_v4 = vrot.slane %v783_v63, %v1847_v32 }
 0x1b3   : > { %v641_v1 = vpop.f32.mrb[0].mxu0 }
 0x1b4   : > { %v643_v2 = vpop.f32.mrb[1].mxu0 }
 0x1b5   : > { %v789_v3 = vcombine.low %v641_v1, %v643_v2 }
 0x1b7   : > { %v796_v6 = vrot.slane %v789_v3, %v1847_v32  ;;  %811 = sbr.rel (%p1078_p7) target bundleno = 943 (0x3af), region = 48 }
 0x1b9   : > { %v804_v8 = vcombine.low %v796_v6, %v803_v4 }
 0x1bb   : > { %v806_v9 = vadd.f32 %v804_v8, %v481_v7 }
 0x1bd   : > { %807 = vst [vmem:[#allocation2] sm:$0x3f] %v806_v9 }
 0x1c4   : > { %v812_v21 = vld [vmem:[#allocation2] sm:$0x3f] }
 0x1c5   : > { %v844_v23 = vadd.f32 %v842_v22, %v812_v21 }
 0x1c7   : > { %v846_v24 = vsel %vm845_vm0, %v844_v23, -inf  ;;  %v900_v25 = vcombine.high %v844_v23, %v844_v23  ;;  %v874_v26 = vrot.slane %v844_v23, %v1847_v32  ;;  %v880_v30 = vrot.slane %v844_v23, 2 }
 0x1c8   : > { %847 = vmax.xlane.f32.xlu0 %v846_v24  ;;  %v912_v31 = vrot.slane %v844_v23, 4 }
 0x1c9   : > { %v907_v19 = vrot.slane %v900_v25, %v1847_v32  ;;  %v875_v27 = vcombine.high %v874_v26, %v874_v26  ;;  %v899_v33 = vadd.f32 %v880_v30, %v844_v23 }
 0x1cb   : > { %v909_v28 = vsel %vm845_vm0, %v907_v19, -inf  ;;  %v877_v29 = vsel %vm845_vm0, %v875_v27, -inf  ;;  %v931_v35 = vadd.f32 %v912_v31, %v899_v33 }
 0x1cc   : > { %910 = vmax.xlane.f32.xlu1 %v909_v28  ;;  %878 = vmax.xlane.f32.xlu0 %v877_v29 }
 0x1cd   : > { %v935_v36 = vmul.f32 0.33333334, %v931_v35 }
 0x1cf   : > { %v936_v37 = vsel %vm934_vm1, %v935_v36, 0.0 }
 0x1d0   : > { %937 = vst [vmem:[#allocation8] sm:$0x3] %v936_v37 }
 0x255   : > { %v848_v38 = vpop.xlane.xlu0 %847 }
 0x256   : > { %v849_v46 = vsub.f32 %v844_v23, %v848_v38 }
 0x258   : > { %v850_v32 = vmul.f32 1.442695, %v849_v46 }
 0x259   : > { %v911_v39 = vpop.xlane.xlu1 %910  ;;  %v879_v40 = vpop.xlane.xlu0 %878 }
 0x25a   : > { %1429 = vpow2.f32 %v850_v32  ;;  %v914_v41 = vsub.f32 %v912_v31, %v911_v39  ;;  %v882_v42 = vsub.f32 %v880_v30, %v879_v40 }
 0x25c   : > { %v915_v43 = vmul.f32 1.442695, %v914_v41  ;;  %v883_v44 = vmul.f32 1.442695, %v882_v42 }
 0x25e   : > { %1431 = vpow2.f32 %v915_v43 }
 0x25f   : > { %1433 = vpow2.f32 %v883_v44 }
 0x264   : > { %v1430_v45 = vpop.eup %1429 }
 0x265   : > { %v852_v5 = vsel %vm845_vm0, %v1430_v45, 0.0 }
 0x266   : > { %853 = vadd.xlane.f32.xlu1 %v852_v5 }
 0x268   : > { %v1432_v14 = vpop.eup %1431 }
 0x269   : > { %v1434_v47 = vpop.eup %1433  ;;  %v917_v48 = vsel %vm845_vm0, %v1432_v14, 0.0 }
 0x26a   : > { %918 = vadd.xlane.f32.xlu1 %v917_v48  ;;  %v885_v49 = vsel %vm845_vm0, %v1434_v47, 0.0 }
 0x26b   : > { %886 = vadd.xlane.f32.xlu0 %v885_v49 }
 0x2f3   : > { %v854_v50 = vpop.xlane.xlu1 %853 }
 0x2f4   : > { %1435 = vrcp.f32 %v854_v50 }
 0x2f7   : > { %v919_v51 = vpop.xlane.xlu1 %918 }
 0x2f8   : > { %1437 = vrcp.f32 %v919_v51  ;;  %v887_v52 = vpop.xlane.xlu0 %886 }
 0x2f9   : > { %1439 = vrcp.f32 %v887_v52 }
 0x2fe   : > { %v1436_v53 = vpop.eup %1435 }
 0x2ff   : > { %v856_v54 = vmul.f32 %v1436_v53, %v1430_v45 }
 0x301   : > { %v857_v55 = vadd.f32 1e-08, %v856_v54 }
 0x302   : > { %v1438_v56 = vpop.eup %1437 }
 0x303   : > { %v1440_v57 = vpop.eup %1439  ;;  %1441 = vlog2.f32 %v857_v55  ;;  %v921_v58 = vmul.f32 %v1438_v56, %v1432_v14 }
 0x304   : > { %v889_v59 = vmul.f32 %v1440_v57, %v1434_v47 }
 0x305   : > { %v922_v60 = vadd.f32 1e-08, %v921_v58 }
 0x306   : > { %v890_v61 = vadd.f32 1e-08, %v889_v59 }
 0x307   : > { %1443 = vlog2.f32 %v922_v60 }
 0x308   : > { %1445 = vlog2.f32 %v890_v61 }
 0x30d   : > { %v1442_v62 = vpop.eup %1441 }
 0x30e   : > { %v859_v63 = vmul.f32 0.6931472, %v1442_v62 }
 0x310   : > { %v860_v1 = vmul.f32 %v859_v63, %v856_v54 }
 0x311   : > { %v1444_v2 = vpop.eup %1443 }
 0x312   : > { %v1446_v3 = vpop.eup %1445  ;;  %v861_v4 = vsel %vm845_vm0, %v860_v1, 0.0  ;;  %v924_v6 = vmul.f32 0.6931472, %v1444_v2 }
 0x313   : > { %862 = vadd.xlane.f32.xlu0 %v861_v4  ;;  %v892_v7 = vmul.f32 0.6931472, %v1446_v3 }
 0x314   : > { %v925_v8 = vmul.f32 %v924_v6, %v921_v58 }
 0x315   : > { %v893_v9 = vmul.f32 %v892_v7, %v889_v59 }
 0x316   : > { %v926_v0 = vsel %vm845_vm0, %v925_v8, 0.0 }
 0x317   : > { %927 = vadd.xlane.f32.xlu0 %v926_v0  ;;  %v894_v10 = vsel %vm845_vm0, %v893_v9, 0.0 }
 0x318   : > { %895 = vadd.xlane.f32.xlu1 %v894_v10 }
 0x3a0   : > { %v863_v11 = vpop.xlane.xlu0 %862 }
 0x3a1   : > { %v864_v15 = vsub.f32 0.0, %v863_v11 }
 0x3a4   : > { %v928_v13 = vpop.xlane.xlu0 %927 }
 0x3a5   : > { %v896_v12 = vpop.xlane.xlu1 %895  ;;  %v929_v18 = vsub.f32 0.0, %v928_v13 }
 0x3a6   : > { %v897_v16 = vsub.f32 0.0, %v896_v12 }
 0x3a8   : > { %v898_v17 = vadd.f32 %v897_v16, %v864_v15 }
 0x3aa   : > { %v930_v20 = vadd.f32 %v929_v18, %v898_v17 }
 0x3ac   : > { %v938_v21 = vmul.f32 0.33333334, %v930_v20 }
 0x3ae   : > { %939 = vst [vmem:[%s2071_s4] sm:$0x3] %v938_v21 }
 0x3af PF: > { %p2023_p9 = scmp.eq.s32.totalorder %s1066_s21, 1  ;;  %s1597_s11 = smov [#allocation8]  }
 0x3b0   : > { %s953_s12 = sshll.u32 %s1597_s11, 4  ;;  %s954_s12 = int_to_ptr.vmem [resolvable:$true] %s953_s12 }
 0x3b1   : > { %s1505_s29 = scalar_lea.vmem %s954_s12, 32  ;;  %p1512_p12 = scmp.lt.s32.totalorder %s954_s12, %s954_s12 }
 0x3b2   : > { %p1506_p10 = scmp.ne.s32.totalorder %s954_s12, %s1505_s29  ;;  %p1513_p1 = scmp.lt.s32.totalorder %s1505_s29, %s1505_s29 }
 0x3b4   : > { %p1507_p13 = pnand %p1506_p10, %p2023_p9  ;;  %p1514_p2 = por %p1513_p1, %p1512_p12 }
 0x3b6   : > { %p1508_p6 = pneg %p1507_p13 }
 0x3b8   : > { %p1515_p5 = pnand %p1514_p2, %p1508_p6 }
 0x3ba   : > { %1518 = shalt.err (!%p1515_p5)
}
 0x3bb   : > { %s1519_s21 = scalar_lea.hbm %s2070_s3, 32 }
 0x3bc   : > { %p1520_p11 = scmp.ne.s32.totalorder %s2070_s3, %s1519_s21  ;;  %p1525_p3 = scmp.lt.u32.totalorder %s1519_s21, %s2070_s3 }
 0x3be   : > { %p1521_p0 = pnand %p1520_p11, %p2023_p9 }
 0x3c0   : > { %p1522_p8 = pneg %p1521_p0 }
 0x3c2   : > { %p1527_p4 = pnand %p1525_p3, %p1522_p8 }
 0x3c4   : > { %1530 = shalt.err (!%p1527_p4)
}
 0x3c5   : > { %1358 = dma.vmem_to_hbm [thread:$0]  (%p2023_p9), %s954_s12, 32, %s2070_s3, [#allocation5]  }
 0x3c6   : > { %1564 = dma.done.wait (%p2023_p9), [#allocation5], 32  }
 0x3c7   : > { %1566 = vsyncadd (%p2023_p9), [#allocation5], 4294967264 }
 0x3c8 PF: > { %s20_s20 = sadd.s32 1, %s1589_s20   ;;  %s2088_s22 = smov %s1759_s15 }
 0x3c9   : > { %p17_p7 = scmp.ge.s32.totalorder %s20_s20, 4   ;;  %s2089_s15 = smov %s1573_s16 }
 0x3ca   : > { %s2090_s16 = smov %s1577_s17  ;;  %s2091_s17 = smov %s2088_s22 }
 0x3cb   : > { %s2092_s18 = smov %s1585_s19  ;;  %s2093_s19 = smov %s2095_s26 }
 0x3cc   :  { %19 = sbr.rel (!%p17_p7) target bundleno = 6 (0x6), region = 97 }
 0x3d3   :  { %976 = vsyncpa [#allocation4], 1 }
 0x3d4   :  { %978 = vsyncpa [#allocation4 + $0x1], 1 }
 0x3d5   :  { %979 = vsyncpa [#allocation7], 1 }
 0x3d6   :  { %980 = vsyncpa [#allocation5], 1 }
 0x3d7   :  { %982 = vsyncpa [#allocation5 + $0x1], 1 }

</bundles_post_ra>
